<compile_context>
chip_gen: v7x
topology: tpu7x:2x2x1
jax: 0.10.0
libtpu: 0.0.40
codegen_flags: <defaults>
</compile_context>

<pallas_src>
import jax
import jax.numpy as jnp
import numpy as np
from jax.experimental import pallas as pl
from jax.experimental.pallas import tpu as pltpu

BN_EPS = 1e-5


def _round_up(x, m):
    return ((x + m - 1) // m) * m


def _vmem_capacity_bytes():
    """Physical VMEM of the local TPU generation (conservative fallback)."""
    try:
        cap = getattr(pltpu.get_tpu_info(), "vmem_capacity_bytes", None)
        if cap:
            return int(cap)
    except Exception:
        pass
    return 64 * 1024 * 1024        # v7x-safe default


# --------------------------------------------------------------------------
# Pallas kernels
# --------------------------------------------------------------------------
def _make_resident_kernel(bsz, count, eps):
    """Whole padded spectrum resident in VMEM: conv -> BN batch stats ->
    fold -> affine + ReLU in a single kernel invocation.

    x_ref:    (B, 2C, Lp) bf16 spectrum (zero lane padding)
    w_ref:    (2C, 2C)    block-diagonal grouped-conv weight (f32)
    b_ref / g_ref / beta_ref: (2C, 1) conv bias / BN gamma / BN beta
    o_ref:    (B, 2C, Lp) bf16 normalized + ReLU'd spectrum
    t_ref:    (B, 2C, Lp) f32 scratch holding the conv result
    """
    inv_count = 1.0 / count

    def kernel(x_ref, w_ref, b_ref, g_ref, beta_ref, o_ref, t_ref):
        w = w_ref[...]
        for bi in range(bsz):                         # static, small batch loop
            t_ref[bi] = jnp.dot(w, x_ref[bi].astype(jnp.float32),
                                preferred_element_type=jnp.float32)
        t = t_ref[...]                                # (B, 2C, Lp) f32
        # Zero-padded lanes contribute exactly 0 (no bias added here), so no
        # lane mask is needed; `count` is the true B*H*Wh element count.
        tb = jnp.sum(t, axis=0)                       # (2C, Lp)
        sum_t = jnp.sum(tb, axis=1, keepdims=True)    # (2C, 1)
        sq_t = jnp.sum(jnp.sum(t * t, axis=0), axis=1, keepdims=True)
        mean_t = sum_t * inv_count
        var_t = sq_t * inv_count - mean_t * mean_t    # shift-invariant == var(y)
        bias = b_ref[...]
        mean_y = mean_t + bias                        # y = t + bias
        scale = g_ref[...] * jax.lax.rsqrt(var_t + eps)
        shift = beta_ref[...] + scale * (bias - mean_y)   # conv bias cancels
        o_ref[...] = jnp.maximum(scale * t + shift, 0.0).astype(o_ref.dtype)

    return kernel


def _conv_stats_kernel(x_ref, w_ref, sum_ref, sq_ref):
    """Tiled pass 1: t = W @ x_tile; accumulate per-channel sum / sumsq.

    Stats outputs are per batch element (resident only across the lane-tile
    axis), so the batch grid axis can be 'parallel' (v7x megacore).  No bias,
    no lane mask: zero-padded lanes contribute exactly zero to both sums.
    """
    @pl.when(pl.program_id(1) == 0)
    def _():
        sum_ref[...] = jnp.zeros_like(sum_ref)
        sq_ref[...] = jnp.zeros_like(sq_ref)

    t = jnp.dot(w_ref[...], x_ref[...].astype(jnp.float32),
                preferred_element_type=jnp.float32)
    sum_ref[...] += jnp.sum(t, axis=1, keepdims=True)
    sq_ref[...] += jnp.sum(t * t, axis=1, keepdims=True)


def _conv_bn_relu_kernel(x_ref, w_ref, b_ref, o_ref):
    """Tiled pass 2: out = relu(w_eff @ x + b_eff); BN folded into the affine."""
    t = jnp.dot(w_ref[...], x_ref[...].astype(jnp.float32),
                preferred_element_type=jnp.float32) + b_ref[...]
    o_ref[...] = jnp.maximum(t, 0.0).astype(o_ref.dtype)


# --------------------------------------------------------------------------
# Parameters
# --------------------------------------------------------------------------
def init_fft_block_params(key, in_channels, groups):
    c2 = 2 * in_channels
    cg = c2 // groups
    # nn.Conv2d-style weight (normal(0, 0.01), mimicking _init_nl), bias 0.
    w = jax.random.normal(key, (c2, cg), dtype=jnp.float32) * 0.01
    blocks = [w[g * cg:(g + 1) * cg] for g in range(groups)]
    w_bd = jax.scipy.linalg.block_diag(*blocks).astype(jnp.float32)  # (2C, 2C)
    return dict(
        w_bd=w_bd,
        bias=jnp.zeros((c2, 1), jnp.float32),
        gamma=jnp.ones((c2, 1), jnp.float32),   # _init_bn: weight=1
        beta=jnp.zeros((c2, 1), jnp.float32),   # _init_bn: bias=0
        # nn.Parameter(torch.zeros(1)) in the module; set to 0.5 here so the
        # FFT branch actually contributes to the output (with 0 it is a no-op).
        alpha=jnp.full((1, 1), 0.5, jnp.float32),
    )


# --------------------------------------------------------------------------
# Wrapper
# --------------------------------------------------------------------------
def _pick_tile(l, c2, cap):
    """Largest lane tile in {1024,512,256,128} not exceeding the 128-rounded
    lane extent whose double-buffered bf16 in/out tiles fit a per-step VMEM
    budget.  The lane dim is then padded to a multiple of the CHOSEN tile."""
    l128 = _round_up(max(l, 1), 128)
    budget = cap // 3
    for t in (1024, 512, 256, 128):
        if t > l128:
            continue
        work = 2 * c2 * t * (2 + 2) + c2 * c2 * 4 + 8 * c2 * 4
        if work <= budget:
            return t
    return 128


def _two_pass(spec, params, b, c2, lp, tile, n_tiles, count, vmem_limit):
    """Tiled fallback for spectra that do not fit VMEM."""
    grid = (b, n_tiles)
    x_spec = pl.BlockSpec((None, c2, tile), lambda bi, ti: (bi, 0, ti))
    w_spec = pl.BlockSpec((c2, c2), lambda bi, ti: (0, 0))        # VMEM-resident
    v_spec = pl.BlockSpec((c2, 1), lambda bi, ti: (0, 0))         # VMEM-resident
    stat_spec = pl.BlockSpec((None, c2, 1), lambda bi, ti: (bi, 0, 0))

    slab_bytes = b * c2 * lp * 2                                  # bf16

    # ---- pass 1: conv + per-(batch, channel) sum / sum-of-squares ----------
    sum_b, sq_b = pl.pallas_call(
        _conv_stats_kernel,
        grid=grid,
        in_specs=[x_spec, w_spec],
        out_specs=(stat_spec, stat_spec),
        out_shape=(jax.ShapeDtypeStruct((b, c2, 1), jnp.float32),
                   jax.ShapeDtypeStruct((b, c2, 1), jnp.float32)),
        compiler_params=pltpu.CompilerParams(
            dimension_semantics=("parallel", "arbitrary"),
            vmem_limit_bytes=vmem_limit),
        cost_estimate=pl.CostEstimate(
            flops=2 * c2 * c2 * b * lp + 3 * c2 * b * lp,
            transcendentals=0,
            bytes_accessed=slab_bytes + c2 * c2 * 4 + 2 * b * c2 * 4),
    )(spec, params["w_bd"])

    # ---- tiny XLA glue: BN batch stats -> fused affine ---------------------
    sum_t = jnp.sum(sum_b, axis=0)              # (c2, 1)
    sq_t = jnp.sum(sq_b, axis=0)
    mean_t = sum_t / count
    var_t = sq_t / count - mean_t * mean_t      # == var of y (shift-invariant)
    scale = params["gamma"] * jax.lax.rsqrt(var_t + BN_EPS)
    w_eff = scale * params["w_bd"]              # fold BN scale into conv rows
    b_eff = params["beta"] - scale * mean_t     # conv bias cancels analytically

    # ---- pass 2: fused conv + BN affine + ReLU, lane-dense tiles ------------
    return pl.pallas_call(
        _conv_bn_relu_kernel,
        grid=grid,
        in_specs=[x_spec, w_spec, v_spec],
        out_specs=pl.BlockSpec((None, c2, tile), lambda bi, ti: (bi, 0, ti)),
        out_shape=jax.ShapeDtypeStruct((b, c2, lp), jnp.bfloat16),
        compiler_params=pltpu.CompilerParams(
            dimension_semantics=("parallel", "parallel"),
            vmem_limit_bytes=vmem_limit),
        cost_estimate=pl.CostEstimate(
            flops=2 * c2 * c2 * b * lp + 2 * c2 * b * lp,
            transcendentals=0,
            bytes_accessed=2 * slab_bytes + c2 * c2 * 4 + c2 * 4),
    )(spec, w_eff, b_eff)


def fft_block_forward(x, params, *, force_two_pass=False):
    b, c, h, w = x.shape
    wh = w // 2 + 1
    c2 = 2 * c
    l = h * wh                                   # true lane extent per batch

    cap = _vmem_capacity_bytes()
    vmem_limit = min(96 * 1024 * 1024, (3 * cap) // 4)   # ~48 MiB v7x, 96 MiB v5e/v6e

    tile = _pick_tile(l, c2, cap)                # tile first ...
    lp = _round_up(l, tile)                      # ... then pad to a tile multiple
    n_tiles = lp // tile

    # rfft over the last two dims, interleave (re, im) per channel.  The
    # (B, 2C, H*Wh) layout is consumed directly via BlockSpec index_maps
    # (no HBM transpose); the lane pad fuses with the stack/reshape producer.
    ff = jnp.fft.rfft2(x)                                    # (b, c, h, wh) complex
    spec = jnp.stack([jnp.real(ff), jnp.imag(ff)], axis=2)   # (b, c, 2, h, wh)
    spec = spec.reshape(b, c2, l).astype(jnp.bfloat16)       # bf16 slab: 2x less HBM
    if lp != l:
        spec = jnp.pad(spec, ((0, 0), (0, 0), (0, lp - l)))

    count = float(b * l)                         # true count (excludes lane pad)

    # ---- dispatch: single resident kernel when the slab fits VMEM ----------
    # per element: bf16 in (double-buffered) + bf16 out (double-buffered)
    #            + f32 conv scratch + f32 elementwise temps  ~= 24 B/elem
    resident_need = b * c2 * lp * 24 + c2 * c2 * 4 + (1 << 20)
    resident_budget = (5 * cap) // 8             # ~40 MiB v7x, ~80 MiB v5e/v6e

    if (not force_two_pass) and resident_need <= resident_budget:
        y = pl.pallas_call(
            _make_resident_kernel(b, count, BN_EPS),
            grid=(1,),
            in_specs=[pl.BlockSpec((b, c2, lp), lambda i: (0, 0, 0)),
                      pl.BlockSpec((c2, c2), lambda i: (0, 0)),
                      pl.BlockSpec((c2, 1), lambda i: (0, 0)),
                      pl.BlockSpec((c2, 1), lambda i: (0, 0)),
                      pl.BlockSpec((c2, 1), lambda i: (0, 0))],
            out_specs=pl.BlockSpec((b, c2, lp), lambda i: (0, 0, 0)),
            out_shape=jax.ShapeDtypeStruct((b, c2, lp), jnp.bfloat16),
            scratch_shapes=[pltpu.VMEM((b, c2, lp), jnp.float32)],
            compiler_params=pltpu.CompilerParams(vmem_limit_bytes=vmem_limit),
        )(spec, params["w_bd"], params["bias"], params["gamma"], params["beta"])
    else:
        y = _two_pass(spec, params, b, c2, lp, tile, n_tiles, count, vmem_limit)

    # Un-interleave, inverse FFT.  The residual alpha*irfft + x stays in XLA so
    # it fuses with the irfft2 epilogue.  NOTE: padded lanes of y hold
    # relu(b_eff) (not zeros); the slice below must stay ahead of the irfft.
    y = y[:, :, :l].astype(jnp.float32).reshape(b, c, 2, h, wh)
    spec_c = y[:, :, 0] + 1j * y[:, :, 1]
    out = jnp.fft.irfft2(spec_c, s=(h, w)).astype(jnp.float32)
    return params["alpha"][0, 0] * out + x.astype(jnp.float32)


# --------------------------------------------------------------------------
# Pure-JAX reference (mirrors the PyTorch forward, training-mode BN)
# --------------------------------------------------------------------------
def fft_block_reference(x, params):
    b, c, h, w = x.shape
    wh = w // 2 + 1
    c2 = 2 * c
    ff = jnp.fft.rfft2(x)
    stacked = jnp.stack([jnp.real(ff), jnp.imag(ff)], axis=2).reshape(b, c2, h, wh)
    y = jnp.einsum("oc,bchw->bohw", params["w_bd"], stacked,
                   precision="highest") + params["bias"].reshape(1, c2, 1, 1)
    mean = jnp.mean(y, axis=(0, 2, 3), keepdims=True)
    var = jnp.mean((y - mean) ** 2, axis=(0, 2, 3), keepdims=True)
    y = (y - mean) / jnp.sqrt(var + BN_EPS)
    y = y * params["gamma"].reshape(1, c2, 1, 1) + params["beta"].reshape(1, c2, 1, 1)
    y = jnp.maximum(y, 0.0)
    y = y.reshape(b, c, 2, h, wh)
    spec_c = y[:, :, 0] + 1j * y[:, :, 1]
    out = jnp.fft.irfft2(spec_c, s=(h, w))
    return params["alpha"][0, 0] * out + x


if __name__ == "__main__":
    key = jax.random.PRNGKey(0)
    k_x, k_w = jax.random.split(key)

    B, C, H, W = 2, 8, 16, 16     # 2C = 16 channels, groups = 8 -> 2 ch/group
    GROUPS = 8

    x = jax.random.normal(k_x, (B, C, H, W), dtype=jnp.float32)
    params = init_fft_block_params(k_w, C, GROUPS)

    ref = jax.block_until_ready(fft_block_reference(x, params))

    # Resident (single-kernel, slab-in-VMEM) path — the one this size selects.
    out = jax.block_until_ready(fft_block_forward(x, params))
    assert out.shape == (B, C, H, W)
    np.testing.assert_allclose(np.asarray(out), np.asarray(ref), rtol=2e-2, atol=2e-2)

    # Also exercise the tiled two-pass fallback used when the slab exceeds VMEM.
    out2 = jax.block_until_ready(fft_block_forward(x, params, force_two_pass=True))
    np.testing.assert_allclose(np.asarray(out2), np.asarray(ref), rtol=2e-2, atol=2e-2)

    print("KERNEL_OK")
</pallas_src>

<mosaic_0001>
module attributes {stable_mosaic.version = 11 : i64} {
  func.func @kernel(%arg0: i32, %arg1: memref<2x16x256xbf16, #tpu.memory_space<vmem>>, %arg2: memref<16x16xf32, #tpu.memory_space<vmem>>, %arg3: memref<16x1xf32, #tpu.memory_space<vmem>>, %arg4: memref<16x1xf32, #tpu.memory_space<vmem>>, %arg5: memref<16x1xf32, #tpu.memory_space<vmem>>, %arg6: memref<2x16x256xbf16, #tpu.memory_space<vmem>>, %arg7: memref<2x16x256xf32, #tpu.memory_space<vmem>>) attributes {dimension_semantics = [#tpu.dimension_semantics<arbitrary>], iteration_bounds = array<i64: 1>, scalar_prefetch = 0 : i64, scratch_operands = 1 : i64, tpu.core_type = #tpu.core_type<tc>, window_params = [{pipeline_mode = #tpu.pipeline_mode<synchronous>, transform_indices = @transform_0, window_bounds = array<i64: 2, 16, 256>}, {pipeline_mode = #tpu.pipeline_mode<synchronous>, transform_indices = @transform_1, window_bounds = array<i64: 16, 16>}, {pipeline_mode = #tpu.pipeline_mode<synchronous>, transform_indices = @transform_2, window_bounds = array<i64: 16, 1>}, {pipeline_mode = #tpu.pipeline_mode<synchronous>, transform_indices = @transform_3, window_bounds = array<i64: 16, 1>}, {pipeline_mode = #tpu.pipeline_mode<synchronous>, transform_indices = @transform_4, window_bounds = array<i64: 16, 1>}, {pipeline_mode = #tpu.pipeline_mode<synchronous>, transform_indices = @transform_5, window_bounds = array<i64: 2, 16, 256>}]} {
    %c0 = arith.constant 0 : index
    %c0_0 = arith.constant 0 : index
    %0 = vector.load %arg2[%c0, %c0_0] : memref<16x16xf32, #tpu.memory_space<vmem>>, vector<16x16xf32>
    %c0_1 = arith.constant 0 : index
    %c0_2 = arith.constant 0 : index
    %c0_3 = arith.constant 0 : index
    %1 = vector.load %arg1[%c0_1, %c0_2, %c0_3] : memref<2x16x256xbf16, #tpu.memory_space<vmem>>, vector<1x16x256xbf16>
    %2 = vector.shape_cast %1 : vector<1x16x256xbf16> to vector<16x256xbf16>
    %3 = arith.extf %2 : vector<16x256xbf16> to vector<16x256xf32>
    %cst = arith.constant dense<0.000000e+00> : vector<16x256xf32>
    %4 = tpu.matmul %0, %3, %cst {dimension_numbers = #tpu.dot_dimension_numbers<[1], [0], [0], [1], [0, 0, 1, 1], [], []>} : vector<16x16xf32>, vector<16x256xf32>, vector<16x256xf32> -> vector<16x256xf32>
    %c0_4 = arith.constant 0 : index
    %c0_5 = arith.constant 0 : index
    %c0_6 = arith.constant 0 : index
    %5 = vector.load %arg7[%c0_4, %c0_5, %c0_6] : memref<2x16x256xf32, #tpu.memory_space<vmem>>, vector<1x16x256xf32>
    %6 = vector.shape_cast %5 : vector<1x16x256xf32> to vector<16x256xf32>
    %7 = vector.shape_cast %4 : vector<16x256xf32> to vector<1x16x256xf32>
    tpu.vector_store %arg7[%c0_4, %c0_5, %c0_6], %7 {strides = array<i32>} : memref<2x16x256xf32, #tpu.memory_space<vmem>>, vector<1x16x256xf32>,
    %c1 = arith.constant 1 : index
    %c0_7 = arith.constant 0 : index
    %c0_8 = arith.constant 0 : index
    %8 = vector.load %arg1[%c1, %c0_7, %c0_8] : memref<2x16x256xbf16, #tpu.memory_space<vmem>>, vector<1x16x256xbf16>
    %9 = vector.shape_cast %8 : vector<1x16x256xbf16> to vector<16x256xbf16>
    %10 = arith.extf %9 : vector<16x256xbf16> to vector<16x256xf32>
    %cst_9 = arith.constant dense<0.000000e+00> : vector<16x256xf32>
    %11 = tpu.matmul %0, %10, %cst_9 {dimension_numbers = #tpu.dot_dimension_numbers<[1], [0], [0], [1], [0, 0, 1, 1], [], []>} : vector<16x16xf32>, vector<16x256xf32>, vector<16x256xf32> -> vector<16x256xf32>
    %c1_10 = arith.constant 1 : index
    %c0_11 = arith.constant 0 : index
    %c0_12 = arith.constant 0 : index
    %12 = vector.load %arg7[%c1_10, %c0_11, %c0_12] : memref<2x16x256xf32, #tpu.memory_space<vmem>>, vector<1x16x256xf32>
    %13 = vector.shape_cast %12 : vector<1x16x256xf32> to vector<16x256xf32>
    %14 = vector.shape_cast %11 : vector<16x256xf32> to vector<1x16x256xf32>
    tpu.vector_store %arg7[%c1_10, %c0_11, %c0_12], %14 {strides = array<i32>} : memref<2x16x256xf32, #tpu.memory_space<vmem>>, vector<1x16x256xf32>,
    %c0_13 = arith.constant 0 : index
    %c0_14 = arith.constant 0 : index
    %c0_15 = arith.constant 0 : index
    %15 = vector.load %arg7[%c0_13, %c0_14, %c0_15] : memref<2x16x256xf32, #tpu.memory_space<vmem>>, vector<2x16x256xf32>
    %cst_16 = arith.constant dense<0.000000e+00> : vector<16x256xf32>
    %16 = vector.multi_reduction <add>, %15, %cst_16 [0] : vector<2x16x256xf32> to vector<16x256xf32>
    %cst_17 = arith.constant dense<0.000000e+00> : vector<16xf32>
    %17 = vector.multi_reduction <add>, %16, %cst_17 [1] : vector<16x256xf32> to vector<16xf32>
    %18 = vector.shape_cast %17 : vector<16xf32> to vector<16x1xf32>
    %19 = arith.mulf %15, %15 : vector<2x16x256xf32>
    %cst_18 = arith.constant dense<0.000000e+00> : vector<16x256xf32>
    %20 = vector.multi_reduction <add>, %19, %cst_18 [0] : vector<2x16x256xf32> to vector<16x256xf32>
    %cst_19 = arith.constant dense<0.000000e+00> : vector<16xf32>
    %21 = vector.multi_reduction <add>, %20, %cst_19 [1] : vector<16x256xf32> to vector<16xf32>
    %22 = vector.shape_cast %21 : vector<16xf32> to vector<16x1xf32>
    %cst_20 = arith.constant 0.00347222225 : f32
    %23 = vector.broadcast %cst_20 : f32 to vector<16x1xf32>
    %24 = arith.mulf %18, %23 : vector<16x1xf32>
    %cst_21 = arith.constant 0.00347222225 : f32
    %25 = vector.broadcast %cst_21 : f32 to vector<16x1xf32>
    %26 = arith.mulf %22, %25 : vector<16x1xf32>
    %27 = arith.mulf %24, %24 : vector<16x1xf32>
    %28 = arith.subf %26, %27 : vector<16x1xf32>
    %c0_22 = arith.constant 0 : index
    %c0_23 = arith.constant 0 : index
    %29 = vector.load %arg3[%c0_22, %c0_23] : memref<16x1xf32, #tpu.memory_space<vmem>>, vector<16x1xf32>
    %30 = arith.addf %24, %29 : vector<16x1xf32>
    %c0_24 = arith.constant 0 : index
    %c0_25 = arith.constant 0 : index
    %31 = vector.load %arg4[%c0_24, %c0_25] : memref<16x1xf32, #tpu.memory_space<vmem>>, vector<16x1xf32>
    %cst_26 = arith.constant 9.99999974E-6 : f32
    %32 = vector.broadcast %cst_26 : f32 to vector<16x1xf32>
    %33 = arith.addf %28, %32 : vector<16x1xf32>
    %34 = math.rsqrt %33 : vector<16x1xf32>
    %35 = arith.mulf %31, %34 : vector<16x1xf32>
    %c0_27 = arith.constant 0 : index
    %c0_28 = arith.constant 0 : index
    %36 = vector.load %arg5[%c0_27, %c0_28] : memref<16x1xf32, #tpu.memory_space<vmem>>, vector<16x1xf32>
    %37 = arith.subf %29, %30 : vector<16x1xf32>
    %38 = arith.mulf %35, %37 : vector<16x1xf32>
    %39 = arith.addf %36, %38 : vector<16x1xf32>
    %40 = vector.shape_cast %35 : vector<16x1xf32> to vector<1x16x1xf32>
    %41 = vector.broadcast %40 : vector<1x16x1xf32> to vector<2x16x256xf32>
    %42 = arith.mulf %41, %15 : vector<2x16x256xf32>
    %43 = vector.shape_cast %39 : vector<16x1xf32> to vector<1x16x1xf32>
    %44 = vector.broadcast %43 : vector<1x16x1xf32> to vector<2x16x256xf32>
    %45 = arith.addf %42, %44 : vector<2x16x256xf32>
    %cst_29 = arith.constant 0.000000e+00 : f32
    %46 = vector.broadcast %cst_29 : f32 to vector<2x16x256xf32>
    %47 = arith.maximumf %45, %46 : vector<2x16x256xf32>
    %48 = arith.truncf %47 : vector<2x16x256xf32> to vector<2x16x256xbf16>
    %c0_30 = arith.constant 0 : index
    %c0_31 = arith.constant 0 : index
    %c0_32 = arith.constant 0 : index
    %49 = vector.load %arg6[%c0_30, %c0_31, %c0_32] : memref<2x16x256xbf16, #tpu.memory_space<vmem>>, vector<2x16x256xbf16>
    tpu.vector_store %arg6[%c0_30, %c0_31, %c0_32], %48 {strides = array<i32>} : memref<2x16x256xbf16, #tpu.memory_space<vmem>>, vector<2x16x256xbf16>,
    return
  }
  func.func @transform_0(%arg0: i32) -> (i32, i32, i32) {
    %c0_i32 = arith.constant 0 : i32
    %c0_i32_0 = arith.constant 0 : i32
    %c0_i32_1 = arith.constant 0 : i32
    %c0_i32_2 = arith.constant 0 : i32
    return %c0_i32, %c0_i32_0, %c0_i32_1 : i32, i32, i32
  }
  func.func @transform_1(%arg0: i32) -> (i32, i32) {
    %c0_i32 = arith.constant 0 : i32
    %c0_i32_0 = arith.constant 0 : i32
    %c0_i32_1 = arith.constant 0 : i32
    return %c0_i32, %c0_i32_0 : i32, i32
  }
  func.func @transform_2(%arg0: i32) -> (i32, i32) {
    %c0_i32 = arith.constant 0 : i32
    %c0_i32_0 = arith.constant 0 : i32
    %c0_i32_1 = arith.constant 0 : i32
    return %c0_i32, %c0_i32_0 : i32, i32
  }
  func.func @transform_3(%arg0: i32) -> (i32, i32) {
    %c0_i32 = arith.constant 0 : i32
    %c0_i32_0 = arith.constant 0 : i32
    %c0_i32_1 = arith.constant 0 : i32
    return %c0_i32, %c0_i32_0 : i32, i32
  }
  func.func @transform_4(%arg0: i32) -> (i32, i32) {
    %c0_i32 = arith.constant 0 : i32
    %c0_i32_0 = arith.constant 0 : i32
    %c0_i32_1 = arith.constant 0 : i32
    return %c0_i32, %c0_i32_0 : i32, i32
  }
  func.func @transform_5(%arg0: i32) -> (i32, i32, i32) {
    %c0_i32 = arith.constant 0 : i32
    %c0_i32_0 = arith.constant 0 : i32
    %c0_i32_1 = arith.constant 0 : i32
    %c0_i32_2 = arith.constant 0 : i32
    return %c0_i32, %c0_i32_0, %c0_i32_1 : i32, i32, i32
  }
}

</mosaic_0001>

<bundles_post_ra>
// kernel: tpu_custom_call.1
= control target key start
LH: loop header
LB: loop body
LE: loop exit
PB: predicated region body
PF: predicated region fallthrough
CT: control target
= control target key end

     0   :  { %v425_v2 = vmov 0.0   ;;  %s556_s0 = inlined_call_operand.vmem [shape: bf16[2,16,256], index: 0, kind: input, shape index: {}]   ;;  %s557_s1 = inlined_call_operand.vmem [shape: f32[16,16], index: 1, kind: input, shape index: {}]   ;;  %s558_s2 = inlined_call_operand.vmem [shape: f32[16,1], index: 2, kind: input, shape index: {}]   ;;  %s559_s3 = inlined_call_operand.vmem [shape: f32[16,1], index: 3, kind: input, shape index: {}]   ;;  %s560_s4 = inlined_call_operand.vmem [shape: f32[16,1], index: 4, kind: input, shape index: {}]   ;;  %s561_s5 = inlined_call_operand.hbm [shape: bf16[2,16,256], index: 5, kind: output, shape index: {}]  }
   0x1   :  { %v391_v0 = vld [vmem:[%s556_s0 + $0x4] ss:$8 sps:$4 sm:$0xff]   ;;  %v393_v1 = vld [vmem:[%s556_s0 + $0x14] ss:$8 sps:$4 sm:$0xff]   ;;  %100 = vmatprep.mubr.f32.mxu0 %v425_v2  ;;  %188 = vmatprep.mubr.f32.mxu1 %v425_v2  ;;  %v395_v3 = vld [vmem:[%s556_s0] ss:$8 sps:$4 sm:$0xff]  }
   0x2   :  { %373 = vmatprep.subr.bf16.mxu0 %v391_v0  ;;  %v396_v4 = vld [vmem:[%s556_s0 + $0x10] ss:$8 sps:$4 sm:$0xff]   ;;  %377 = vmatprep.subr.bf16.mxu1 %v393_v1 }
   0x3   :  { %10 = vsyncpa [#allocation4], 0  ;;  %375 = vmatpush1.bf16.msra.mxu0 %v395_v3  ;;  %379 = vmatpush1.bf16.msra.mxu1 %v396_v4  ;;  %v21_v5 = vld [vmem:[%s557_s1] sm:$0xff]  ;;  %vm29_vm0 = vcmask 130048   ;;  %v22_v6 = vld [vmem:[%s557_s1 + $0x8] sm:$0xff]  ;;  %v426_v35 = vmov 0  }
   0x4   :  { %389 = vset.pattern.permute.xlu0 %v426_v35  ;;  %390 = vset.pattern.permute.xlu1 %v426_v35  ;;  %v250_v50 = vld [vmem:[%s558_s2] sm:$0xff]  ;;  %v251_v54 = vld [vmem:[%s558_s2 + $0x8] sm:$0xff] }
   0x5   :  { %v254_v51 = vld [vmem:[%s559_s3] sm:$0xff]  ;;  %v255_v56 = vld [vmem:[%s559_s3 + $0x8] sm:$0xff]  ;;  %s427_s3 = smov [#allocation3]  }
   0x6   :  { %358 = vmatmul.mubr.msk.f32.vlgmr.msra.gmra.mrb[0].mxu0 %vm29_vm0, %v21_v5  ;;  %362 = vmatmul.mubr.msk.f32.vlgmr.msra.gmra.mrb[0].mxu1 %vm29_vm0, %v21_v5  ;;  %v262_v62 = vld [vmem:[%s560_s4] sm:$0xff] }
   0x7   :  { %106 = vmatprep.mubr.f32.mxu0 %v425_v2  ;;  %194 = vmatprep.mubr.f32.mxu1 %v425_v2  ;;  %v263_v2 = vld [vmem:[%s560_s4 + $0x8] sm:$0xff]  ;;  %s347_s4 = sshll.u32 %s427_s3, 4  ;;  %s348_s4 = int_to_ptr.vmem [resolvable:$true] %s347_s4 }
   0x8   :  { %s401_s14 = scalar_lea.vmem %s348_s4, 512  ;;  %p406_p1 = scmp.lt.s32.totalorder %s348_s4, %s348_s4 }
   0x9   :  { %p402_p0 = scmp.ne.s32.totalorder %s348_s4, %s401_s14  ;;  %p407_p2 = scmp.lt.s32.totalorder %s401_s14, %s401_s14 }
   0xa   :  { %359 = vmatmul.mubr.msk.f32.gmra.mrb[2].mxu0 %vm29_vm0, %v22_v6  ;;  %363 = vmatmul.mubr.msk.f32.gmra.mrb[2].mxu1 %vm29_vm0, %v22_v6 }
   0xb   :  { %p408_p3 = por %p407_p2, %p406_p1 }
   0xd   :  { %p409_p4 = pnand %p408_p3, %p402_p0 }
  0xd9   :  { %v478_v7 = vpop.f32.mrb[0].mxu0  ;;  %v480_v8 = vpop.f32.mrb[0].mxu1 }
  0xda   :  { %v224_v9 = vmul.f32 %v478_v7, %v478_v7  ;;  %v228_v10 = vmul.f32 %v480_v8, %v480_v8  ;;  %v486_v11 = vpop.f32.mrb[1].mxu0  ;;  %v488_v12 = vpop.f32.mrb[1].mxu1  ;;  %v214_v13 = vadd.f32 %v480_v8, %v478_v7 }
  0xdb   :  { %v225_v14 = vmul.f32 %v486_v11, %v486_v11  ;;  %v229_v15 = vmul.f32 %v488_v12, %v488_v12  ;;  %v215_v16 = vadd.f32 %v488_v12, %v486_v11 }
  0xdc   :  { %v232_v17 = vadd.f32 %v228_v10, %v224_v9 }
  0xdd   :  { %v498_v18 = vpop.f32.mrb[2].mxu0  ;;  %v500_v19 = vpop.f32.mrb[2].mxu1  ;;  %v218_v20 = vadd.f32 %v215_v16, %v214_v13  ;;  %v233_v21 = vadd.f32 %v229_v15, %v225_v14 }
  0xde   :  { %v226_v22 = vmul.f32 %v498_v18, %v498_v18  ;;  %v230_v23 = vmul.f32 %v500_v19, %v500_v19  ;;  %v506_v24 = vpop.f32.mrb[3].mxu0  ;;  %v508_v25 = vpop.f32.mrb[3].mxu1  ;;  %v216_v26 = vadd.f32 %v500_v19, %v498_v18 }
  0xdf   :  { %v227_v27 = vmul.f32 %v506_v24, %v506_v24  ;;  %v217_v28 = vadd.f32 %v508_v25, %v506_v24  ;;  %v231_v29 = vmul.f32 %v508_v25, %v508_v25  ;;  %219 = vadd.xlane.f32.xlu0 %v218_v20  ;;  %v236_v30 = vadd.f32 %v233_v21, %v232_v17 }
  0xe0   :  { %v234_v31 = vadd.f32 %v230_v23, %v226_v22 }
  0xe1   :  { %237 = vadd.xlane.f32.xlu1 %v236_v30  ;;  %v221_v32 = vadd.f32 %v217_v28, %v216_v26  ;;  %v235_v33 = vadd.f32 %v231_v29, %v227_v27 }
  0xe3   :  { %222 = vadd.xlane.f32.xlu0 %v221_v32  ;;  %v239_v34 = vadd.f32 %v235_v33, %v234_v31 }
  0xe5   :  { %240 = vadd.xlane.f32.xlu1 %v239_v34 }
 0x16c   :  { %v220_v36 = vpop.xlane.xlu0 %219 }
 0x16d   :  { %v242_v37 = vmul.f32 0.0034722222, %v220_v36 }
 0x16e   :  { %v238_v38 = vpop.xlane.xlu1 %237 }
 0x16f   :  { %v246_v39 = vmul.f32 %v242_v37, %v242_v37  ;;  %v244_v40 = vmul.f32 0.0034722222, %v238_v38  ;;  %v252_v52 = vadd.f32 %v250_v50, %v242_v37 }
 0x170   :  { %v223_v41 = vpop.xlane.xlu0 %222 }
 0x171   :  { %v248_v42 = vsub.f32 %v244_v40, %v246_v39  ;;  %v243_v43 = vmul.f32 0.0034722222, %v223_v41  ;;  %v264_v57 = vsub.f32 %v250_v50, %v252_v52 }
 0x172   :  { %v241_v44 = vpop.xlane.xlu1 %240 }
 0x173   :  { %v256_v45 = vadd.f32 1e-05, %v248_v42  ;;  %v247_v46 = vmul.f32 %v243_v43, %v243_v43  ;;  %v245_v47 = vmul.f32 0.0034722222, %v241_v44  ;;  %v253_v58 = vadd.f32 %v251_v54, %v243_v43 }
 0x175   :  { %397 = vrsqrt.f32 %v256_v45  ;;  %v249_v48 = vsub.f32 %v245_v47, %v247_v46  ;;  %v265_v63 = vsub.f32 %v251_v54, %v253_v58 }
 0x177   :  { %v257_v49 = vadd.f32 1e-05, %v249_v48 }
 0x179   :  { %399 = vrsqrt.f32 %v257_v49 }
 0x17f   :  { %v398_v53 = vpop.eup %397 }
 0x180   :  { %v260_v55 = vmul.f32 %v398_v53, %v254_v51 }
 0x182   :  { %272 = vperm.xlu0 %389, %v260_v55   ;;  %v266_v61 = vmul.f32 %v264_v57, %v260_v55 }
 0x183   :  { %v400_v59 = vpop.eup %399 }
 0x184   :  { %v261_v60 = vmul.f32 %v400_v59, %v255_v56  ;;  %v268_v0 = vadd.f32 %v266_v61, %v262_v62 }
 0x186   :  { %277 = vperm.xlu1 %390, %v261_v60   ;;  %v267_v1 = vmul.f32 %v265_v63, %v261_v60 }
 0x188   :  { %v269_v3 = vadd.f32 %v267_v1, %v263_v2 }
 0x18a   :  { %290 = vperm.xlu1 %390, %v268_v0  }
 0x18e   :  { %295 = vperm.xlu1 %390, %v269_v3  }
 0x201   :  { %v273_v4 = vpop.permute.xlu0 %272 }
 0x202   :  { %v280_v6 = vmul.f32 %v273_v4, %v478_v7  ;;  %v281_v9 = vmul.f32 %v273_v4, %v486_v11  ;;  %v284_v10 = vmul.f32 %v273_v4, %v480_v8  ;;  %v285_v13 = vmul.f32 %v273_v4, %v488_v12 }
 0x205   :  { %v278_v5 = vpop.permute.xlu1 %277 }
 0x206   :  { %v282_v21 = vmul.f32 %v278_v5, %v498_v18  ;;  %v283_v22 = vmul.f32 %v278_v5, %v506_v24  ;;  %v286_v7 = vmul.f32 %v278_v5, %v500_v19  ;;  %v287_v11 = vmul.f32 %v278_v5, %v508_v25 }
 0x209   :  { %v291_v14 = vpop.permute.xlu1 %290 }
 0x20a   :  { %v298_v15 = vadd.f32 %v291_v14, %v280_v6  ;;  %v299_v16 = vadd.f32 %v291_v14, %v281_v9  ;;  %v302_v17 = vadd.f32 %v291_v14, %v284_v10  ;;  %v303_v20 = vadd.f32 %v291_v14, %v285_v13 }
 0x20c   :  { %v306_v23 = vmax.f32 %v298_v15, 0.0  ;;  %v307_v26 = vmax.f32 %v299_v16, 0.0  ;;  %v310_v27 = vmax.f32 %v302_v17, 0.0  ;;  %v311_v28 = vmax.f32 %v303_v20, 0.0 }
 0x20d   :  { %v296_v8 = vpop.permute.xlu1 %295 }
 0x20e   :  { %v368_v29 = vpack.c.bf16 %v307_v26, %v306_v23  ;;  %v370_v12 = vpack.c.bf16 %v311_v28, %v310_v27  ;;  %v300_v30 = vadd.f32 %v296_v8, %v282_v21  ;;  %v301_v31 = vadd.f32 %v296_v8, %v283_v22 }
 0x20f   :  { %v304_v32 = vadd.f32 %v296_v8, %v286_v7  ;;  %v305_v33 = vadd.f32 %v296_v8, %v287_v11 }
 0x210   :  { %338 = vst [vmem:[#allocation3] sm:$0xff] %v368_v29  ;;  %340 = vst [vmem:[#allocation3 + $0x10] sm:$0xff] %v370_v12  ;;  %v308_v18 = vmax.f32 %v300_v30, 0.0  ;;  %v309_v24 = vmax.f32 %v301_v31, 0.0 }
 0x211   :  { %v312_v34 = vmax.f32 %v304_v32, 0.0  ;;  %v313_v35 = vmax.f32 %v305_v33, 0.0 }
 0x212   :  { %v369_v36 = vpack.c.bf16 %v309_v24, %v308_v18 }
 0x213   :  { %v371_v19 = vpack.c.bf16 %v313_v35, %v312_v34 }
 0x214   :  { %339 = vst [vmem:[#allocation3 + $0x8] sm:$0xff] %v369_v36 }
 0x215   :  { %341 = vst [vmem:[#allocation3 + $0x18] sm:$0xff] %v371_v19 }
 0x216   :  { %412 = shalt.err (!%p409_p4)
}
 0x217   :  { %s413_s17 = scalar_lea.hbm %s561_s5, 512 }
 0x218   :  { %p414_p5 = scmp.ne.s32.totalorder %s561_s5, %s413_s17  ;;  %p417_p6 = scmp.lt.u32.totalorder %s413_s17, %s561_s5 }
 0x21a   :  { %p419_p7 = pnand %p417_p6, %p414_p5 }
 0x21c   :  { %422 = shalt.err (!%p419_p7)
}
 0x21d   :  { %s428_s22 = smov 128   ;;  %s429_s23 = smov 8  }
 0x21e   :  { %353 = dma.vmem_to_hbm [thread:$0]  %s348_s4, 512, %s561_s5, [#allocation4], %s428_s22, %s428_s22, %s429_s23  }
 0x21f   :  { %423 = dma.done.wait [#allocation4], 512  }
 0x220   :  { %424 = vsyncadd [#allocation4], 4294966784 }
 0x221   :  { %357 = vsyncpa [#allocation4], 1 }

</bundles_post_ra>
